<compile_context>
chip_gen: v7x
topology: tpu7x:2x2x1
jax: 0.10.0
libtpu: 0.0.40
codegen_flags: <defaults>
</compile_context>

<pallas_src>
import jax
import jax.numpy as jnp
from jax import lax
from jax.experimental import pallas as pl
from jax.experimental.pallas import tpu as pltpu

EPS = 1e-5


def _layernorm(x, gamma, beta):
    # Reduction is over the last (full-D, lane) axis.
    mean = jnp.mean(x, axis=-1, keepdims=True)
    xc = x - mean
    var = jnp.mean(xc * xc, axis=-1, keepdims=True)
    inv = lax.rsqrt(var + EPS)
    return xc * inv * gamma + beta


def lora_merge_kernel(base_ref, lora_ref, params_ref, out_ref):
    base = base_ref[...].astype(jnp.float32)      # (TS, D)
    lora = lora_ref[...].astype(jnp.float32)      # (N, TS, D)

    # Packed per-dim parameters, each read as a (1, D) row vector.
    wb   = params_ref[pl.ds(0, 1), :]
    wl   = params_ref[pl.ds(1, 1), :]
    wc   = params_ref[pl.ds(2, 1), :]
    wo   = params_ref[pl.ds(3, 1), :]
    bias = params_ref[pl.ds(4, 1), :]
    gb   = params_ref[pl.ds(5, 1), :]
    bb   = params_ref[pl.ds(6, 1), :]
    gl   = params_ref[pl.ds(7, 1), :]
    bl   = params_ref[pl.ds(8, 1), :]

    # Base LayerNorm computed once per S-tile (independent of the LoRA index).
    norm_base = _layernorm(base, gb, bb)          # (TS, D)
    norm_lora = _layernorm(lora, gl, bl)          # (N, TS, D)

    gate = jax.nn.sigmoid(
        norm_base * wb
        + norm_lora * wl
        + norm_base * norm_lora * wc
        + bias
    )                                             # (N, TS, D)

    # f32 accumulation over the (small) LoRA axis, single cast + store.
    contrib = (wo * gate * lora).sum(axis=0)      # (TS, D)
    out_ref[...] = (base + contrib).astype(out_ref.dtype)


def _pick_row_tile(S, target=256):
    """Largest multiple-of-8 row tile <= target that divides S (or S itself)."""
    if S <= target:
        return S
    for ts in range(target, 7, -8):
        if S % ts == 0:
            return ts
    return S  # no nice divisor; fall back to a single full-S tile


def lora_merger(base_output, lora_outputs, params, *, row_tile=None):
    """base_output: (S, D); lora_outputs: (N, S, D).  D must never be split
    (LayerNorm reduces over the whole row)."""
    S, D = base_output.shape
    N = lora_outputs.shape[0]
    assert lora_outputs.shape[1:] == (S, D)

    TS = _pick_row_tile(S) if row_tile is None else row_tile
    assert S % TS == 0, "row tile must divide S"

    # Pack the 9 per-dim parameter vectors into a single (9, D) slab.
    packed_params = jnp.stack(
        [
            params["weight_base"], params["weight_lora"],
            params["weight_cross"], params["weight_out"],
            params["bias"],
            params["norm_base_gamma"], params["norm_base_beta"],
            params["norm_lora_gamma"], params["norm_lora_beta"],
        ],
        axis=0,
    ).astype(jnp.float32)                         # (9, D)

    base_spec  = pl.BlockSpec((TS, D),    lambda i: (i, 0))
    lora_spec  = pl.BlockSpec((N, TS, D), lambda i: (0, i, 0))
    param_spec = pl.BlockSpec((9, D),     lambda i: (0, 0))
    out_spec   = pl.BlockSpec((TS, D),    lambda i: (i, 0))

    return pl.pallas_call(
        lora_merge_kernel,
        out_shape=jax.ShapeDtypeStruct((S, D), base_output.dtype),
        grid_spec=pltpu.PrefetchScalarGridSpec(
            num_scalar_prefetch=0,
            grid=(S // TS,),
            in_specs=[base_spec, lora_spec, param_spec],
            out_specs=out_spec,
        ),
        compiler_params=pltpu.CompilerParams(
            dimension_semantics=("parallel",),
            vmem_limit_bytes=48 * 1024 * 1024,
        ),
    )(base_output, lora_outputs, packed_params)


def lora_merger_ref(base_output, lora_outputs, params):
    def ln(x, g, b):
        m = jnp.mean(x, axis=-1, keepdims=True)
        v = jnp.mean((x - m) ** 2, axis=-1, keepdims=True)
        return (x - m) / jnp.sqrt(v + EPS) * g + b

    nb = ln(base_output, params["norm_base_gamma"], params["norm_base_beta"])
    nl = ln(lora_outputs, params["norm_lora_gamma"], params["norm_lora_beta"])
    gate = jax.nn.sigmoid(nb * params["weight_base"]
                          + nl * params["weight_lora"]
                          + nb * nl * params["weight_cross"]
                          + params["bias"])
    return base_output + (params["weight_out"] * gate * lora_outputs).sum(axis=0)


if __name__ == "__main__":
    key = jax.random.PRNGKey(0)
    N, S, D = 3, 16, 128  # num LoRAs, seq, hidden dim (D multiple of 128)

    ks = jax.random.split(key, 8)
    base_output = jax.random.normal(ks[0], (S, D), jnp.float32)
    lora_outputs = jax.random.normal(ks[1], (N, S, D), jnp.float32)

    params = {
        "weight_base": jax.random.normal(ks[2], (D,), jnp.float32),
        "weight_lora": jax.random.normal(ks[3], (D,), jnp.float32),
        "weight_cross": jax.random.normal(ks[4], (D,), jnp.float32),
        "weight_out": jnp.ones((D,), jnp.float32),
        "bias": jax.random.normal(ks[5], (D,), jnp.float32),
        # PyTorch LayerNorm default affine init: weight=1, bias=0
        "norm_base_gamma": jnp.ones((D,), jnp.float32),
        "norm_base_beta": jnp.zeros((D,), jnp.float32),
        "norm_lora_gamma": jnp.ones((D,), jnp.float32),
        "norm_lora_beta": jnp.zeros((D,), jnp.float32),
    }

    out = jax.block_until_ready(lora_merger(base_output, lora_outputs, params))
    ref = lora_merger_ref(base_output, lora_outputs, params)

    assert out.shape == (S, D)
    assert jnp.allclose(out, ref, atol=1e-4, rtol=1e-4), \
        f"max err {jnp.max(jnp.abs(out - ref))}"
    print("KERNEL_OK")
</pallas_src>

<mosaic_0001>
module attributes {stable_mosaic.version = 11 : i64} {
  func.func @lora_merge_kernel(%arg0: i32, %arg1: memref<16x128xf32, #tpu.memory_space<vmem>>, %arg2: memref<3x16x128xf32, #tpu.memory_space<vmem>>, %arg3: memref<9x128xf32, #tpu.memory_space<vmem>>, %arg4: memref<16x128xf32, #tpu.memory_space<vmem>>) attributes {dimension_semantics = [#tpu.dimension_semantics<parallel>], iteration_bounds = array<i64: 1>, scalar_prefetch = 0 : i64, scratch_operands = 0 : i64, tpu.core_type = #tpu.core_type<tc>, window_params = [{transform_indices = @transform_0, window_bounds = array<i64: 16, 128>}, {transform_indices = @transform_1, window_bounds = array<i64: 3, 16, 128>}, {pipeline_mode = #tpu.pipeline_mode<synchronous>, transform_indices = @transform_2, window_bounds = array<i64: 9, 128>}, {transform_indices = @transform_3, window_bounds = array<i64: 16, 128>}]} {
    %c0 = arith.constant 0 : index
    %c0_0 = arith.constant 0 : index
    %0 = vector.load %arg1[%c0, %c0_0] : memref<16x128xf32, #tpu.memory_space<vmem>>, vector<16x128xf32>
    %c0_1 = arith.constant 0 : index
    %c0_2 = arith.constant 0 : index
    %c0_3 = arith.constant 0 : index
    %1 = vector.load %arg2[%c0_1, %c0_2, %c0_3] : memref<3x16x128xf32, #tpu.memory_space<vmem>>, vector<3x16x128xf32>
    %c0_4 = arith.constant 0 : index
    %c0_5 = arith.constant 0 : index
    %2 = vector.load %arg3[%c0_4, %c0_5] : memref<9x128xf32, #tpu.memory_space<vmem>>, vector<1x128xf32>
    %c1 = arith.constant 1 : index
    %c0_6 = arith.constant 0 : index
    %3 = vector.load %arg3[%c1, %c0_6] : memref<9x128xf32, #tpu.memory_space<vmem>>, vector<1x128xf32>
    %c2 = arith.constant 2 : index
    %c0_7 = arith.constant 0 : index
    %4 = vector.load %arg3[%c2, %c0_7] : memref<9x128xf32, #tpu.memory_space<vmem>>, vector<1x128xf32>
    %c3 = arith.constant 3 : index
    %c0_8 = arith.constant 0 : index
    %5 = vector.load %arg3[%c3, %c0_8] : memref<9x128xf32, #tpu.memory_space<vmem>>, vector<1x128xf32>
    %c4 = arith.constant 4 : index
    %c0_9 = arith.constant 0 : index
    %6 = vector.load %arg3[%c4, %c0_9] : memref<9x128xf32, #tpu.memory_space<vmem>>, vector<1x128xf32>
    %c5 = arith.constant 5 : index
    %c0_10 = arith.constant 0 : index
    %7 = vector.load %arg3[%c5, %c0_10] : memref<9x128xf32, #tpu.memory_space<vmem>>, vector<1x128xf32>
    %c6 = arith.constant 6 : index
    %c0_11 = arith.constant 0 : index
    %8 = vector.load %arg3[%c6, %c0_11] : memref<9x128xf32, #tpu.memory_space<vmem>>, vector<1x128xf32>
    %c7 = arith.constant 7 : index
    %c0_12 = arith.constant 0 : index
    %9 = vector.load %arg3[%c7, %c0_12] : memref<9x128xf32, #tpu.memory_space<vmem>>, vector<1x128xf32>
    %c8 = arith.constant 8 : index
    %c0_13 = arith.constant 0 : index
    %10 = vector.load %arg3[%c8, %c0_13] : memref<9x128xf32, #tpu.memory_space<vmem>>, vector<1x128xf32>
    %cst = arith.constant dense<0.000000e+00> : vector<16xf32>
    %11 = vector.multi_reduction <add>, %0, %cst [1] : vector<16x128xf32> to vector<16xf32>
    %12 = vector.shape_cast %11 : vector<16xf32> to vector<16x1xf32>
    %cst_14 = arith.constant 1.280000e+02 : f32
    %13 = vector.broadcast %cst_14 : f32 to vector<16x1xf32>
    %14 = arith.divf %12, %13 : vector<16x1xf32>
    %15 = vector.broadcast %14 : vector<16x1xf32> to vector<16x128xf32>
    %16 = arith.subf %0, %15 : vector<16x128xf32>
    %17 = arith.mulf %16, %16 : vector<16x128xf32>
    %cst_15 = arith.constant dense<0.000000e+00> : vector<16xf32>
    %18 = vector.multi_reduction <add>, %17, %cst_15 [1] : vector<16x128xf32> to vector<16xf32>
    %19 = vector.shape_cast %18 : vector<16xf32> to vector<16x1xf32>
    %cst_16 = arith.constant 1.280000e+02 : f32
    %20 = vector.broadcast %cst_16 : f32 to vector<16x1xf32>
    %21 = arith.divf %19, %20 : vector<16x1xf32>
    %cst_17 = arith.constant 9.99999974E-6 : f32
    %22 = vector.broadcast %cst_17 : f32 to vector<16x1xf32>
    %23 = arith.addf %21, %22 : vector<16x1xf32>
    %24 = math.rsqrt %23 : vector<16x1xf32>
    %25 = vector.broadcast %24 : vector<16x1xf32> to vector<16x128xf32>
    %26 = arith.mulf %16, %25 : vector<16x128xf32>
    %27 = vector.broadcast %7 : vector<1x128xf32> to vector<16x128xf32>
    %28 = arith.mulf %26, %27 : vector<16x128xf32>
    %29 = vector.broadcast %8 : vector<1x128xf32> to vector<16x128xf32>
    %30 = arith.addf %28, %29 : vector<16x128xf32>
    %cst_18 = arith.constant dense<0.000000e+00> : vector<3x16xf32>
    %31 = vector.multi_reduction <add>, %1, %cst_18 [2] : vector<3x16x128xf32> to vector<3x16xf32>
    %32 = vector.shape_cast %31 : vector<3x16xf32> to vector<3x16x1xf32>
    %cst_19 = arith.constant 1.280000e+02 : f32
    %33 = vector.broadcast %cst_19 : f32 to vector<3x16x1xf32>
    %34 = arith.divf %32, %33 : vector<3x16x1xf32>
    %35 = vector.broadcast %34 : vector<3x16x1xf32> to vector<3x16x128xf32>
    %36 = arith.subf %1, %35 : vector<3x16x128xf32>
    %37 = arith.mulf %36, %36 : vector<3x16x128xf32>
    %cst_20 = arith.constant dense<0.000000e+00> : vector<3x16xf32>
    %38 = vector.multi_reduction <add>, %37, %cst_20 [2] : vector<3x16x128xf32> to vector<3x16xf32>
    %39 = vector.shape_cast %38 : vector<3x16xf32> to vector<3x16x1xf32>
    %cst_21 = arith.constant 1.280000e+02 : f32
    %40 = vector.broadcast %cst_21 : f32 to vector<3x16x1xf32>
    %41 = arith.divf %39, %40 : vector<3x16x1xf32>
    %cst_22 = arith.constant 9.99999974E-6 : f32
    %42 = vector.broadcast %cst_22 : f32 to vector<3x16x1xf32>
    %43 = arith.addf %41, %42 : vector<3x16x1xf32>
    %44 = math.rsqrt %43 : vector<3x16x1xf32>
    %45 = vector.broadcast %44 : vector<3x16x1xf32> to vector<3x16x128xf32>
    %46 = arith.mulf %36, %45 : vector<3x16x128xf32>
    %47 = vector.shape_cast %9 : vector<1x128xf32> to vector<1x1x128xf32>
    %48 = vector.broadcast %47 : vector<1x1x128xf32> to vector<3x16x128xf32>
    %49 = arith.mulf %46, %48 : vector<3x16x128xf32>
    %50 = vector.shape_cast %10 : vector<1x128xf32> to vector<1x1x128xf32>
    %51 = vector.broadcast %50 : vector<1x1x128xf32> to vector<3x16x128xf32>
    %52 = arith.addf %49, %51 : vector<3x16x128xf32>
    %53 = vector.broadcast %2 : vector<1x128xf32> to vector<16x128xf32>
    %54 = arith.mulf %30, %53 : vector<16x128xf32>
    %55 = vector.shape_cast %3 : vector<1x128xf32> to vector<1x1x128xf32>
    %56 = vector.broadcast %55 : vector<1x1x128xf32> to vector<3x16x128xf32>
    %57 = arith.mulf %52, %56 : vector<3x16x128xf32>
    %58 = vector.shape_cast %54 : vector<16x128xf32> to vector<1x16x128xf32>
    %59 = vector.broadcast %58 : vector<1x16x128xf32> to vector<3x16x128xf32>
    %60 = arith.addf %59, %57 : vector<3x16x128xf32>
    %61 = vector.shape_cast %30 : vector<16x128xf32> to vector<1x16x128xf32>
    %62 = vector.broadcast %61 : vector<1x16x128xf32> to vector<3x16x128xf32>
    %63 = arith.mulf %62, %52 : vector<3x16x128xf32>
    %64 = vector.shape_cast %4 : vector<1x128xf32> to vector<1x1x128xf32>
    %65 = vector.broadcast %64 : vector<1x1x128xf32> to vector<3x16x128xf32>
    %66 = arith.mulf %63, %65 : vector<3x16x128xf32>
    %67 = arith.addf %60, %66 : vector<3x16x128xf32>
    %68 = vector.shape_cast %6 : vector<1x128xf32> to vector<1x1x128xf32>
    %69 = vector.broadcast %68 : vector<1x1x128xf32> to vector<3x16x128xf32>
    %70 = arith.addf %67, %69 : vector<3x16x128xf32>
    %71 = arith.negf %70 : vector<3x16x128xf32>
    %72 = math.exp %71 : vector<3x16x128xf32>
    %cst_23 = arith.constant 1.000000e+00 : f32
    %73 = vector.broadcast %cst_23 : f32 to vector<3x16x128xf32>
    %74 = arith.addf %73, %72 : vector<3x16x128xf32>
    %75 = arith.divf %73, %74 : vector<3x16x128xf32>
    %76 = vector.shape_cast %5 : vector<1x128xf32> to vector<1x1x128xf32>
    %77 = vector.broadcast %76 : vector<1x1x128xf32> to vector<3x16x128xf32>
    %78 = arith.mulf %77, %75 : vector<3x16x128xf32>
    %79 = arith.mulf %78, %1 : vector<3x16x128xf32>
    %cst_24 = arith.constant dense<0.000000e+00> : vector<16x128xf32>
    %80 = vector.multi_reduction <add>, %79, %cst_24 [0] : vector<3x16x128xf32> to vector<16x128xf32>
    %81 = arith.addf %0, %80 : vector<16x128xf32>
    %c0_25 = arith.constant 0 : index
    %c0_26 = arith.constant 0 : index
    %82 = vector.load %arg4[%c0_25, %c0_26] : memref<16x128xf32, #tpu.memory_space<vmem>>, vector<16x128xf32>
    tpu.vector_store %arg4[%c0_25, %c0_26], %81 {strides = array<i32>} : memref<16x128xf32, #tpu.memory_space<vmem>>, vector<16x128xf32>,
    return
  }
  func.func @transform_0(%arg0: i32) -> (i32, i32) {
    %c0_i32 = arith.constant 0 : i32
    %c0_i32_0 = arith.constant 0 : i32
    return %arg0, %c0_i32 : i32, i32
  }
  func.func @transform_1(%arg0: i32) -> (i32, i32, i32) {
    %c0_i32 = arith.constant 0 : i32
    %c0_i32_0 = arith.constant 0 : i32
    %c0_i32_1 = arith.constant 0 : i32
    return %c0_i32, %arg0, %c0_i32_0 : i32, i32, i32
  }
  func.func @transform_2(%arg0: i32) -> (i32, i32) {
    %c0_i32 = arith.constant 0 : i32
    %c0_i32_0 = arith.constant 0 : i32
    %c0_i32_1 = arith.constant 0 : i32
    return %c0_i32, %c0_i32_0 : i32, i32
  }
  func.func @transform_3(%arg0: i32) -> (i32, i32) {
    %c0_i32 = arith.constant 0 : i32
    %c0_i32_0 = arith.constant 0 : i32
    return %arg0, %c0_i32 : i32, i32
  }
}

</mosaic_0001>

<bundles_post_ra>
// kernel: tpu_custom_call.1
= control target key start
LH: loop header
LB: loop body
LE: loop exit
PB: predicated region body
PF: predicated region fallthrough
CT: control target
= control target key end

     0   :  { %8 = vsyncpa [#allocation3], 0  ;;  %s654_s0 = inlined_call_operand.hbm [shape: f32[16,128], index: 0, kind: input, shape index: {}]   ;;  %s655_s1 = inlined_call_operand.hbm [shape: f32[3,16,128], index: 1, kind: input, shape index: {}]   ;;  %s656_s2 = inlined_call_operand.hbm [shape: f32[9,128], index: 2, kind: input, shape index: {}]   ;;  %s657_s3 = inlined_call_operand.hbm [shape: f32[16,128], index: 3, kind: output, shape index: {}]  }
   0x1   :  { %9 = vsyncpa [#allocation6], 0 }
   0x2   :  { %10 = vsyncpa [#allocation4], 0  ;;  %s481_s12 = smov [#allocation5]   ;;  %s482_s14 = smov [#allocation2]  }
   0x3   :  { %s28_s13 = sshll.u32 %s481_s12, 4  ;;  %s16_s15 = sshll.u32 %s482_s14, 4  ;;  %s29_s13 = int_to_ptr.vmem [resolvable:$true] %s28_s13  ;;  %s507_s15 = int_to_ptr.vmem [resolvable:$true] %s16_s15 }
   0x4   :  { %s387_s18 = scalar_lea.hbm %s655_s1, 768 }
   0x5   :  { %p388_p0 = scmp.ne.s32.totalorder %s655_s1, %s387_s18  ;;  %p391_p1 = scmp.lt.u32.totalorder %s387_s18, %s655_s1 }
   0x7   :  { %p393_p2 = pnand %p391_p1, %p388_p0 }
   0x9   :  { %396 = shalt.err (!%p393_p2)
}
   0xa   :  { %s397_s23 = scalar_lea.vmem %s29_s13, 768  ;;  %p402_p4 = scmp.lt.s32.totalorder %s29_s13, %s29_s13 }
   0xb   :  { %p398_p3 = scmp.ne.s32.totalorder %s29_s13, %s397_s23  ;;  %p403_p5 = scmp.lt.s32.totalorder %s397_s23, %s397_s23 }
   0xd   :  { %p404_p6 = por %p403_p5, %p402_p4 }
   0xf   :  { %p405_p7 = pnand %p404_p6, %p398_p3 }
  0x11   :  { %408 = shalt.err (!%p405_p7)
}
  0x12   :  { %s483_s24 = smov 128   ;;  %s484_s25 = smov 8  }
  0x13   :  { %34 = dma.hbm_to_vmem [thread:$0]  %s655_s1, 768, %s29_s13, [#allocation6], %s483_s24, %s483_s24, %s484_s25  }
  0x14   :  { %s409_s30 = scalar_lea.hbm %s654_s0, 256 }
  0x15   :  { %p410_p8 = scmp.ne.s32.totalorder %s654_s0, %s409_s30  ;;  %p413_p9 = scmp.lt.u32.totalorder %s409_s30, %s654_s0 }
  0x17   :  { %p415_p10 = pnand %p413_p9, %p410_p8 }
  0x19   :  { %418 = shalt.err (!%p415_p10)
}
  0x1a   :  { %s419_s8 = scalar_lea.vmem %s507_s15, 256  ;;  %p424_p12 = scmp.lt.s32.totalorder %s507_s15, %s507_s15 }
  0x1b   :  { %p420_p11 = scmp.ne.s32.totalorder %s507_s15, %s419_s8  ;;  %p425_p13 = scmp.lt.s32.totalorder %s419_s8, %s419_s8 }
  0x1d   :  { %p426_p0 = por %p425_p13, %p424_p12 }
  0x1f   :  { %p427_p1 = pnand %p426_p0, %p420_p11 }
  0x21   :  { %430 = shalt.err (!%p427_p1)
}
  0x22   :  { %22 = dma.hbm_to_vmem [thread:$0]  %s654_s0, 256, %s507_s15, [#allocation3], %s483_s24, %s483_s24, %s484_s25  }
  0x23   :  { %s485_s10 = smov [#allocation7]   ;;  %s431_s14 = scalar_lea.hbm %s656_s2, 256 }
  0x24   :  { %s40_s11 = sshll.u32 %s485_s10, 4  ;;  %p432_p2 = scmp.ne.s32.totalorder %s656_s2, %s431_s14  ;;  %s41_s11 = int_to_ptr.vmem [resolvable:$true] %s40_s11 }
  0x25   :  { %p435_p3 = scmp.lt.u32.totalorder %s431_s14, %s656_s2 }
  0x27   :  { %p437_p4 = pnand %p435_p3, %p432_p2 }
  0x29   :  { %440 = shalt.err (!%p437_p4)
}
  0x2a   :  { %s441_s20 = scalar_lea.vmem %s41_s11, 256  ;;  %p446_p6 = scmp.lt.s32.totalorder %s41_s11, %s41_s11 }
  0x2b   :  { %p442_p5 = scmp.ne.s32.totalorder %s41_s11, %s441_s20  ;;  %p447_p7 = scmp.lt.s32.totalorder %s441_s20, %s441_s20 }
  0x2d   :  { %p448_p8 = por %p447_p7, %p446_p6 }
  0x2f   :  { %p449_p9 = pnand %p448_p8, %p442_p5 }
  0x31   :  { %452 = shalt.err (!%p449_p9)
}
  0x32   :  { %46 = dma.hbm_to_vmem [thread:$0]  %s656_s2, 256, %s41_s11, [#allocation6], %s483_s24, %s483_s24, %s484_s25  }
  0x33   :  { %475 = dma.done.wait [#allocation3], 256  }
  0x34   :  { %476 = vsyncadd [#allocation3], 4294967040 }
  0x35   :  { %477 = dma.done.wait [#allocation6], 1024  }
  0x36   :  { %478 = vsyncadd [#allocation6], 4294966272  ;;  %v559_v0 = vld [vmem:[#allocation2] sm:$0xff]  ;;  %v561_v1 = vld [vmem:[#allocation5] sm:$0xff]  ;;  %s486_s2 = smov [#allocation8]  }
  0x37   :  { %73 = vadd.xlane.f32.xlu0 %v559_v0  ;;  %108 = vadd.xlane.f32.xlu1 %v561_v1  ;;  %v565_v2 = vld [vmem:[#allocation2 + $0x8] sm:$0xff]  ;;  %v567_v3 = vld [vmem:[#allocation5 + $0x8] sm:$0xff]  ;;  %v571_v4 = vld [vmem:[#allocation5 + $0x10] sm:$0xff]  ;;  %s313_s21 = sshll.u32 %s486_s2, 4  ;;  %s314_s21 = int_to_ptr.vmem [resolvable:$true] %s313_s21 }
  0x38   :  { %v573_v5 = vld [vmem:[#allocation5 + $0x18] sm:$0xff]  ;;  %v577_v6 = vld [vmem:[#allocation5 + $0x20] sm:$0xff]  ;;  %v579_v7 = vld [vmem:[#allocation5 + $0x28] sm:$0xff]  ;;  %s453_s22 = scalar_lea.vmem %s314_s21, 256  ;;  %p458_p11 = scmp.lt.s32.totalorder %s314_s21, %s314_s21 }
  0x39   :  { %v326_v62 = vld [vmem:[#allocation7 + $0x5] ss:$0 sm:$0xff]  ;;  %p454_p10 = scmp.ne.s32.totalorder %s314_s21, %s453_s22  ;;  %p459_p12 = scmp.lt.s32.totalorder %s453_s22, %s453_s22 }
  0x3b   :  { %75 = vadd.xlane.f32.xlu0 %v565_v2  ;;  %110 = vadd.xlane.f32.xlu1 %v567_v3  ;;  %p460_p13 = por %p459_p12, %p458_p11 }
  0x3d   :  { %p461_p0 = pnand %p460_p13, %p454_p10 }
  0x3f   :  { %112 = vadd.xlane.f32.xlu0 %v571_v4  ;;  %114 = vadd.xlane.f32.xlu1 %v573_v5 }
  0x43   :  { %116 = vadd.xlane.f32.xlu0 %v577_v6  ;;  %118 = vadd.xlane.f32.xlu1 %v579_v7 }
  0xc4   :  { %v74_v8 = vpop.xlane.xlu0 %73  ;;  %v109_v9 = vpop.xlane.xlu1 %108 }
  0xc5   :  { %v78_v10 = vmul.f32 0.0078125, %v74_v8  ;;  %v120_v11 = vmul.f32 0.0078125, %v109_v9 }
  0xc7   :  { %v584_v12 = vsub.f32 %v559_v0, %v78_v10  ;;  %v587_v13 = vsub.f32 %v561_v1, %v120_v11 }
  0xc8   :  { %v76_v14 = vpop.xlane.xlu0 %75  ;;  %v111_v15 = vpop.xlane.xlu1 %110 }
  0xc9   :  { %v79_v16 = vmul.f32 0.0078125, %v76_v14  ;;  %v82_v17 = vmul.f32 %v584_v12, %v584_v12  ;;  %v121_v18 = vmul.f32 0.0078125, %v111_v15  ;;  %v132_v21 = vmul.f32 %v587_v13, %v587_v13 }
  0xcb   :  { %v592_v19 = vsub.f32 %v565_v2, %v79_v16  ;;  %84 = vadd.xlane.f32.xlu0 %v82_v17  ;;  %v595_v20 = vsub.f32 %v567_v3, %v121_v18  ;;  %v327_v16 = vld [vmem:[#allocation7 + $0x6] ss:$0 sm:$0xff]  ;;  %v328_v18 = vld [vmem:[#allocation7 + $0x7] ss:$0 sm:$0xff] }
  0xcc   :  { %v113_v22 = vpop.xlane.xlu0 %112  ;;  %v115_v23 = vpop.xlane.xlu1 %114 }
  0xcd   :  { %v122_v24 = vmul.f32 0.0078125, %v113_v22  ;;  %v83_v25 = vmul.f32 %v592_v19, %v592_v19  ;;  %v123_v26 = vmul.f32 0.0078125, %v115_v23  ;;  %v133_v29 = vmul.f32 %v595_v20, %v595_v20  ;;  %v329_v23 = vld [vmem:[#allocation7 + $0x8] ss:$0 sm:$0xff] }
  0xcf   :  { %v602_v27 = vsub.f32 %v571_v4, %v122_v24  ;;  %138 = vadd.xlane.f32.xlu0 %v132_v21  ;;  %86 = vadd.xlane.f32.xlu1 %v83_v25  ;;  %v605_v28 = vsub.f32 %v573_v5, %v123_v26 }
  0xd0   :  { %v117_v30 = vpop.xlane.xlu0 %116  ;;  %v119_v31 = vpop.xlane.xlu1 %118 }
  0xd1   :  { %v124_v32 = vmul.f32 0.0078125, %v117_v30  ;;  %v134_v33 = vmul.f32 %v602_v27, %v602_v27  ;;  %v125_v34 = vmul.f32 0.0078125, %v119_v31  ;;  %v135_v37 = vmul.f32 %v605_v28, %v605_v28  ;;  %v331_v30 = vld [vmem:[#allocation7 + $0x1] ss:$0 sm:$0xff] }
  0xd3   :  { %v612_v35 = vsub.f32 %v577_v6, %v124_v32  ;;  %140 = vadd.xlane.f32.xlu1 %v133_v29  ;;  %142 = vadd.xlane.f32.xlu0 %v134_v33  ;;  %v615_v36 = vsub.f32 %v579_v7, %v125_v34  ;;  %v330_v29 = vld [vmem:[#allocation7] ss:$0 sm:$0xff] }
  0xd5   :  { %v136_v38 = vmul.f32 %v612_v35, %v612_v35  ;;  %v137_v39 = vmul.f32 %v615_v36, %v615_v36 }
  0xd7   :  { %144 = vadd.xlane.f32.xlu1 %v135_v37  ;;  %146 = vadd.xlane.f32.xlu0 %v136_v38  ;;  %v332_v37 = vld [vmem:[#allocation7 + $0x2] ss:$0 sm:$0xff] }
  0xdb   :  { %148 = vadd.xlane.f32.xlu1 %v137_v39 }
 0x158   :  { %v85_v40 = vpop.xlane.xlu0 %84 }
 0x159   :  { %v88_v41 = vmul.f32 0.0078125, %v85_v40 }
 0x15b   :  { %v90_v42 = vadd.f32 1e-05, %v88_v41 }
 0x15c   :  { %v87_v43 = vpop.xlane.xlu1 %86  ;;  %v139_v44 = vpop.xlane.xlu0 %138 }
 0x15d   :  { %347 = vrsqrt.f32 %v90_v42  ;;  %v89_v45 = vmul.f32 0.0078125, %v87_v43  ;;  %v150_v46 = vmul.f32 0.0078125, %v139_v44 }
 0x15f   :  { %v91_v47 = vadd.f32 1e-05, %v89_v45  ;;  %v156_v48 = vadd.f32 1e-05, %v150_v46 }
 0x160   :  { %v141_v49 = vpop.xlane.xlu1 %140  ;;  %v143_v50 = vpop.xlane.xlu0 %142 }
 0x161   :  { %349 = vrsqrt.f32 %v91_v47  ;;  %v151_v51 = vmul.f32 0.0078125, %v141_v49  ;;  %v152_v52 = vmul.f32 0.0078125, %v143_v50  ;;  %v333_v49 = vld [vmem:[#allocation7 + $0x4] ss:$0 sm:$0xff] }
 0x162   :  { %351 = vrsqrt.f32 %v156_v48 }
 0x163   :  { %v157_v53 = vadd.f32 1e-05, %v151_v51  ;;  %v158_v54 = vadd.f32 1e-05, %v152_v52 }
 0x164   :  { %v145_v55 = vpop.xlane.xlu1 %144  ;;  %v147_v56 = vpop.xlane.xlu0 %146 }
 0x165   :  { %353 = vrsqrt.f32 %v157_v53  ;;  %v153_v57 = vmul.f32 0.0078125, %v145_v55  ;;  %v154_v58 = vmul.f32 0.0078125, %v147_v56 }
 0x166   :  { %355 = vrsqrt.f32 %v158_v54 }
 0x167   :  { %v348_v59 = vpop.eup %347  ;;  %v159_v60 = vadd.f32 1e-05, %v153_v57  ;;  %v160_v61 = vadd.f32 1e-05, %v154_v58 }
 0x168   :  { %v94_v63 = vmul.f32 %v348_v59, %v584_v12  ;;  %v149_v8 = vpop.xlane.xlu1 %148 }
 0x169   :  { %357 = vrsqrt.f32 %v159_v60  ;;  %v155_v9 = vmul.f32 0.0078125, %v149_v8 }
 0x16a   :  { %359 = vrsqrt.f32 %v160_v61  ;;  %v100_v11 = vmul.f32 %v326_v62, %v94_v63 }
 0x16b   :  { %v350_v10 = vpop.eup %349  ;;  %v161_v14 = vadd.f32 1e-05, %v155_v9 }
 0x16c   :  { %v352_v15 = vpop.eup %351  ;;  %v95_v17 = vmul.f32 %v350_v10, %v592_v19  ;;  %v106_v25 = vadd.f32 %v327_v16, %v100_v11 }
 0x16d   :  { %v168_v21 = vmul.f32 %v352_v15, %v587_v13  ;;  %361 = vrsqrt.f32 %v161_v14 }
 0x16e   :  { %v101_v22 = vmul.f32 %v326_v62, %v95_v17  ;;  %v198_v39 = vmul.f32 %v330_v29, %v106_v25 }
 0x16f   :  { %v354_v24 = vpop.eup %353  ;;  %v178_v12 = vmul.f32 %v328_v18, %v168_v21 }
 0x170   :  { %v356_v26 = vpop.eup %355  ;;  %v169_v31 = vmul.f32 %v354_v24, %v595_v20  ;;  %v107_v34 = vadd.f32 %v327_v16, %v101_v22 }
 0x171   :  { %v188_v32 = vadd.f32 %v329_v23, %v178_v12  ;;  %v170_v33 = vmul.f32 %v356_v26, %v602_v27 }
 0x172   :  { %v179_v19 = vmul.f32 %v328_v18, %v169_v31  ;;  %v199_v48 = vmul.f32 %v330_v29, %v107_v34 }
 0x173   :  { %v358_v38 = vpop.eup %357  ;;  %v204_v13 = vmul.f32 %v331_v30, %v188_v32  ;;  %v216_v40 = vmul.f32 %v188_v32, %v106_v25  ;;  %v180_v41 = vmul.f32 %v328_v18, %v170_v33 }
 0x174   :  { %v360_v42 = vpop.eup %359  ;;  %v189_v43 = vadd.f32 %v329_v23, %v179_v19  ;;  %v171_v44 = vmul.f32 %v358_v38, %v605_v28 }
 0x175   :  { %v210_v45 = vadd.f32 %v204_v13, %v198_v39  ;;  %v226_v46 = vmul.f32 %v332_v37, %v216_v40  ;;  %v190_v47 = vadd.f32 %v329_v23, %v180_v41  ;;  %v172_v20 = vmul.f32 %v360_v42, %v612_v35 }
 0x176   :  { %v205_v27 = vmul.f32 %v331_v30, %v189_v43  ;;  %v217_v50 = vmul.f32 %v189_v43, %v107_v34  ;;  %v181_v51 = vmul.f32 %v328_v18, %v171_v44 }
 0x177   :  { %v362_v52 = vpop.eup %361  ;;  %v232_v53 = vadd.f32 %v226_v46, %v210_v45  ;;  %v206_v54 = vmul.f32 %v331_v30, %v190_v47  ;;  %v218_v55 = vmul.f32 %v190_v47, %v106_v25  ;;  %v182_v56 = vmul.f32 %v328_v18, %v172_v20 }
 0x178   :  { %v211_v57 = vadd.f32 %v205_v27, %v199_v48  ;;  %v227_v58 = vmul.f32 %v332_v37, %v217_v50  ;;  %v191_v59 = vadd.f32 %v329_v23, %v181_v51  ;;  %v173_v28 = vmul.f32 %v362_v52, %v615_v36  ;;  %v340_v52 = vld [vmem:[#allocation7 + $0x3] ss:$0 sm:$0xff] }
 0x179   :  { %v242_v60 = vadd.f32 %v333_v49, %v232_v53  ;;  %v212_v61 = vadd.f32 %v206_v54, %v198_v39  ;;  %v228_v62 = vmul.f32 %v332_v37, %v218_v55  ;;  %v192_v63 = vadd.f32 %v329_v23, %v182_v56 }
 0x17a   :  { %v233_v35 = vadd.f32 %v227_v58, %v211_v57  ;;  %v207_v8 = vmul.f32 %v331_v30, %v191_v59  ;;  %v219_v9 = vmul.f32 %v191_v59, %v107_v34  ;;  %v183_v10 = vmul.f32 %v328_v18, %v173_v28 }
 0x17b   :  { %v334_v11 = vmul.f32 -1.442695, %v242_v60  ;;  %v234_v14 = vadd.f32 %v228_v62, %v212_v61  ;;  %v208_v15 = vmul.f32 %v331_v30, %v192_v63  ;;  %v220_v16 = vmul.f32 %v192_v63, %v106_v25 }
 0x17c   :  { %v243_v17 = vadd.f32 %v333_v49, %v233_v35  ;;  %v213_v21 = vadd.f32 %v207_v8, %v199_v48  ;;  %v229_v22 = vmul.f32 %v332_v37, %v219_v9  ;;  %v193_v24 = vadd.f32 %v329_v23, %v183_v10 }
 0x17d   :  { %363 = vpow2.f32 %v334_v11  ;;  %v244_v12 = vadd.f32 %v333_v49, %v234_v14  ;;  %v214_v26 = vadd.f32 %v208_v15, %v198_v39  ;;  %v230_v36 = vmul.f32 %v332_v37, %v220_v16 }
 0x17e   :  { %v335_v29 = vmul.f32 -1.442695, %v243_v17  ;;  %v235_v31 = vadd.f32 %v229_v22, %v213_v21  ;;  %v209_v32 = vmul.f32 %v331_v30, %v193_v24  ;;  %v221_v33 = vmul.f32 %v193_v24, %v107_v34 }
 0x17f   :  { %v336_v19 = vmul.f32 -1.442695, %v244_v12  ;;  %v236_v38 = vadd.f32 %v230_v36, %v214_v26 }
 0x180   :  { %365 = vpow2.f32 %v335_v29  ;;  %v245_v18 = vadd.f32 %v333_v49, %v235_v31  ;;  %v215_v13 = vadd.f32 %v209_v32, %v199_v48  ;;  %v231_v40 = vmul.f32 %v332_v37, %v221_v33 }
 0x181   :  { %367 = vpow2.f32 %v336_v19  ;;  %v246_v25 = vadd.f32 %v333_v49, %v236_v38 }
 0x182   :  { %v337_v41 = vmul.f32 -1.442695, %v245_v18  ;;  %v237_v42 = vadd.f32 %v231_v40, %v215_v13 }
 0x183   :  { %v338_v43 = vmul.f32 -1.442695, %v246_v25 }
 0x184   :  { %369 = vpow2.f32 %v337_v41  ;;  %v247_v23 = vadd.f32 %v333_v49, %v237_v42 }
 0x185   :  { %371 = vpow2.f32 %v338_v43 }
 0x186   :  { %v339_v39 = vmul.f32 -1.442695, %v247_v23 }
 0x187   :  { %v364_v44 = vpop.eup %363 }
 0x188   :  { %373 = vpow2.f32 %v339_v39  ;;  %v266_v45 = vadd.f32 1.0, %v364_v44 }
 0x18a   :  { %v366_v30 = vpop.eup %365  ;;  %375 = vrcp.f32 %v266_v45 }
 0x18b   :  { %v368_v34 = vpop.eup %367  ;;  %v267_v46 = vadd.f32 1.0, %v366_v30 }
 0x18c   :  { %v268_v47 = vadd.f32 1.0, %v368_v34 }
 0x18e   :  { %v370_v20 = vpop.eup %369  ;;  %377 = vrcp.f32 %v268_v47 }
 0x18f   :  { %v372_v37 = vpop.eup %371  ;;  %v269_v48 = vadd.f32 1.0, %v370_v20  ;;  %379 = vrcp.f32 %v267_v46 }
 0x190   :  { %v270_v27 = vadd.f32 1.0, %v372_v37 }
 0x191   :  { %381 = vrcp.f32 %v269_v48 }
 0x192   :  { %v374_v50 = vpop.eup %373  ;;  %383 = vrcp.f32 %v270_v27 }
 0x193   :  { %v271_v49 = vadd.f32 1.0, %v374_v50 }
 0x194   :  { %v376_v51 = vpop.eup %375 }
 0x195   :  { %385 = vrcp.f32 %v271_v49  ;;  %v288_v55 = vmul.f32 %v376_v51, %v340_v52 }
 0x197   :  { %v294_v62 = vmul.f32 %v288_v55, %v561_v1 }
 0x198   :  { %v378_v53 = vpop.eup %377 }
 0x199   :  { %v380_v54 = vpop.eup %379  ;;  %v290_v56 = vmul.f32 %v378_v53, %v340_v52 }
 0x19a   :  { %v289_v28 = vmul.f32 %v380_v54, %v340_v52 }
 0x19b   :  { %v382_v57 = vpop.eup %381  ;;  %v296_v58 = vmul.f32 %v290_v56, %v571_v4 }
 0x19c   :  { %v384_v59 = vpop.eup %383  ;;  %v291_v60 = vmul.f32 %v382_v57, %v340_v52  ;;  %v295_v11 = vmul.f32 %v289_v28, %v567_v3 }
 0x19d   :  { %v292_v61 = vmul.f32 %v384_v59, %v340_v52  ;;  %v300_v9 = vadd.f32 %v296_v58, %v294_v62 }
 0x19e   :  { %v297_v63 = vmul.f32 %v291_v60, %v573_v5 }
 0x19f   :  { %v386_v35 = vpop.eup %385  ;;  %v298_v8 = vmul.f32 %v292_v61, %v577_v6 }
 0x1a0   :  { %v293_v10 = vmul.f32 %v386_v35, %v340_v52  ;;  %v302_v16 = vadd.f32 %v297_v63, %v295_v11 }
 0x1a1   :  { %v301_v14 = vadd.f32 %v300_v9, %v298_v8 }
 0x1a2   :  { %v299_v15 = vmul.f32 %v293_v10, %v579_v7 }
 0x1a3   :  { %v304_v4 = vadd.f32 %v301_v14, %v559_v0 }
 0x1a4   :  { %v303_v17 = vadd.f32 %v302_v16, %v299_v15 }
 0x1a5   :  { %306 = vst [vmem:[#allocation8] sm:$0xff] %v304_v4 }
 0x1a6   :  { %v305_v1 = vadd.f32 %v303_v17, %v565_v2 }
 0x1a8   :  { %307 = vst [vmem:[#allocation8 + $0x8] sm:$0xff] %v305_v1 }
 0x1a9   :  { %464 = shalt.err (!%p461_p0)
}
 0x1aa   :  { %s465_s27 = scalar_lea.hbm %s657_s3, 256 }
 0x1ab   :  { %p466_p1 = scmp.ne.s32.totalorder %s657_s3, %s465_s27  ;;  %p469_p2 = scmp.lt.u32.totalorder %s465_s27, %s657_s3 }
 0x1ad   :  { %p471_p3 = pnand %p469_p2, %p466_p1 }
 0x1af   :  { %474 = shalt.err (!%p471_p3)
}
 0x1b0   :  { %319 = dma.vmem_to_hbm [thread:$0]  %s314_s21, 256, %s657_s3, [#allocation4], %s483_s24, %s483_s24, %s484_s25  }
 0x1b1   :  { %479 = dma.done.wait [#allocation4], 256  }
 0x1b2   :  { %480 = vsyncadd [#allocation4], 4294967040 }
 0x1b3   :  { %323 = vsyncpa [#allocation3], 1 }
 0x1b4   :  { %324 = vsyncpa [#allocation6], 1 }
 0x1b5   :  { %325 = vsyncpa [#allocation4], 1 }

</bundles_post_ra>
